<compile_context>
chip_gen: v5e
topology: v5e:2x2
jax: 0.10.0
libtpu: 0.0.40
codegen_flags: <defaults>
</compile_context>

<pallas_src>
import jax
import jax.numpy as jnp
from jax import lax
from jax.experimental import pallas as pl
from jax.experimental.pallas import tpu as pltpu

HIDDEN = 128


def _round_up(n, m):
    return ((n + m - 1) // m) * m


# Contract the last axis of the activations with the last axis (in_features) of the
# (out_features, in_features) weight: (TB, in) x (out, in) -> (TB, out). Same math as
# x @ W.T but expressed without a transpose (no XLU pass, no materialized VMEM copy).
_DN = (((1,), (1,)), ((), ()))


def double_dqn_kernel(x_ref, w1_ref, w2_ref, w3_ref, o_ref):
    xb = x_ref[...].astype(jnp.bfloat16)                       # (TB, in)
    h1 = lax.dot_general(xb, w1_ref[...], _DN, preferred_element_type=jnp.float32)
    h1 = jnp.maximum(h1, 0.0).astype(jnp.bfloat16)              # (TB, H)
    h2 = lax.dot_general(h1, w2_ref[...], _DN, preferred_element_type=jnp.float32)
    h2 = jnp.maximum(h2, 0.0).astype(jnp.bfloat16)              # (TB, H)
    o_ref[...] = lax.dot_general(h2, w3_ref[...], _DN, preferred_element_type=jnp.float32)


def pack_params(params):
    """Precompute the effective noisy weights W = mu + sigma*eps (f32 math) and cast to bf16.

    Epsilon is a fixed buffer during a forward pass, so this is semantically identical to
    forming the weight inside the kernel, but removes per-tile elementwise work and cuts the
    weight DMA / resident footprint ~6x.
    """
    def eff(l):
        return (params[f"mu{l}"] + params[f"sig{l}"] * params[f"eps{l}"]).astype(jnp.bfloat16)

    return eff(1), eff(2), eff(3)


def double_dqn_forward(x, weights, *, block_b=4096):
    """x: (B, input_dim) float32. weights: output of pack_params. Returns (B, output_dim) f32."""
    w1, w2, w3 = weights
    B, in_dim = x.shape
    out_dim = w3.shape[0]

    # Batch tile: multiple of 8 sublanes, capped at block_b (the primary tuning knob).
    tb = min(block_b, _round_up(B, 8))
    # Keep >= 2 grid steps when the tile would swallow the whole batch, so both v7x
    # TensorCores get a share of the work (harmless single extra step on v5e/v6e).
    if _round_up(B, tb) == tb and tb > 8:
        tb = _round_up((tb + 1) // 2, 8)

    b_pad = _round_up(B, tb)
    if b_pad != B:
        x = jnp.pad(x, ((0, b_pad - B), (0, 0)))

    out = pl.pallas_call(
        double_dqn_kernel,
        out_shape=jax.ShapeDtypeStruct((b_pad, out_dim), jnp.float32),
        grid=(b_pad // tb,),
        in_specs=[
            pl.BlockSpec((tb, in_dim), lambda i: (i, 0)),   # x: tiled over the batch
            pl.BlockSpec(w1.shape, lambda i: (0, 0)),       # bf16 weights: VMEM-resident
            pl.BlockSpec(w2.shape, lambda i: (0, 0)),
            pl.BlockSpec(w3.shape, lambda i: (0, 0)),
        ],
        out_specs=pl.BlockSpec((tb, out_dim), lambda i: (i, 0)),   # unpadded, full out_dim
        compiler_params=pltpu.CompilerParams(
            dimension_semantics=("parallel",)),             # v7x megacore; no-op on v5e/v6e
    )(x, w1, w2, w3)
    return out[:B]


def init_params(key, input_dim, output_dim):
    """Deterministic synthetic init matching NoisyLinear.reset_parameters:
    mu ~ U(-0.2, 0.2), sigma = 0.017, epsilon ~ N(0, 1) (buffer)."""
    ks = jax.random.split(key, 6)

    def layer(kmu, keps, out_f, in_f):
        mu = jax.random.uniform(kmu, (out_f, in_f), jnp.float32, -0.2, 0.2)
        sig = jnp.full((out_f, in_f), 0.017, jnp.float32)
        eps = jax.random.normal(keps, (out_f, in_f), jnp.float32)
        return mu, sig, eps

    mu1, sig1, eps1 = layer(ks[0], ks[1], HIDDEN, input_dim)
    mu2, sig2, eps2 = layer(ks[2], ks[3], HIDDEN, HIDDEN)
    mu3, sig3, eps3 = layer(ks[4], ks[5], output_dim, HIDDEN)
    return dict(mu1=mu1, sig1=sig1, eps1=eps1,
                mu2=mu2, sig2=sig2, eps2=eps2,
                mu3=mu3, sig3=sig3, eps3=eps3)


def double_dqn_reference(x, p):
    # Pure f32 reference with the exact PyTorch semantics.
    w1 = p["mu1"] + p["sig1"] * p["eps1"]
    w2 = p["mu2"] + p["sig2"] * p["eps2"]
    w3 = p["mu3"] + p["sig3"] * p["eps3"]
    h1 = jnp.maximum(x @ w1.T, 0.0)
    h2 = jnp.maximum(h1 @ w2.T, 0.0)
    return h2 @ w3.T


if __name__ == "__main__":
    key = jax.random.PRNGKey(0)
    k_x, k_p = jax.random.split(key)

    batch, input_dim, output_dim = 8, 16, 4
    x = jax.random.normal(k_x, (batch, input_dim), jnp.float32)
    params = init_params(k_p, input_dim, output_dim)
    weights = pack_params(params)

    out = double_dqn_forward(x, weights)
    out = jax.block_until_ready(out)

    ref = double_dqn_reference(x, params)
    assert out.shape == (batch, output_dim), out.shape
    # bf16 weights / MXU inputs with f32 accumulation -> small rounding vs the pure-f32 reference.
    assert jnp.allclose(out, ref, atol=5e-2, rtol=5e-2), float(jnp.max(jnp.abs(out - ref)))

    print("KERNEL_OK")
</pallas_src>

<mosaic_0001>
module attributes {stable_mosaic.version = 11 : i64} {
  func.func @double_dqn_kernel(%arg0: i32, %arg1: memref<8x16xf32, #tpu.memory_space<vmem>>, %arg2: memref<128x16xbf16, #tpu.memory_space<vmem>>, %arg3: memref<128x128xbf16, #tpu.memory_space<vmem>>, %arg4: memref<4x128xbf16, #tpu.memory_space<vmem>>, %arg5: memref<8x4xf32, #tpu.memory_space<vmem>>) attributes {dimension_semantics = [#tpu.dimension_semantics<parallel>], iteration_bounds = array<i64: 1>, scalar_prefetch = 0 : i64, scratch_operands = 0 : i64, tpu.core_type = #tpu.core_type<tc>, window_params = [{transform_indices = @transform_0, window_bounds = array<i64: 8, 16>}, {pipeline_mode = #tpu.pipeline_mode<synchronous>, transform_indices = @transform_1, window_bounds = array<i64: 128, 16>}, {pipeline_mode = #tpu.pipeline_mode<synchronous>, transform_indices = @transform_2, window_bounds = array<i64: 128, 128>}, {pipeline_mode = #tpu.pipeline_mode<synchronous>, transform_indices = @transform_3, window_bounds = array<i64: 4, 128>}, {transform_indices = @transform_4, window_bounds = array<i64: 8, 4>}]} {
    %c0 = arith.constant 0 : index
    %c0_0 = arith.constant 0 : index
    %0 = vector.load %arg1[%c0, %c0_0] : memref<8x16xf32, #tpu.memory_space<vmem>>, vector<8x16xf32>
    %1 = arith.truncf %0 : vector<8x16xf32> to vector<8x16xbf16>
    %c0_1 = arith.constant 0 : index
    %c0_2 = arith.constant 0 : index
    %2 = vector.load %arg2[%c0_1, %c0_2] : memref<128x16xbf16, #tpu.memory_space<vmem>>, vector<128x16xbf16>
    %cst = arith.constant dense<0.000000e+00> : vector<8x128xf32>
    %3 = tpu.matmul %1, %2, %cst {dimension_numbers = #tpu.dot_dimension_numbers<[1], [1], [0], [0], [0, 0, 1, 0], [], []>} : vector<8x16xbf16>, vector<128x16xbf16>, vector<8x128xf32> -> vector<8x128xf32>
    %cst_3 = arith.constant 0.000000e+00 : f32
    %4 = vector.broadcast %cst_3 : f32 to vector<8x128xf32>
    %5 = arith.maximumf %3, %4 : vector<8x128xf32>
    %6 = arith.truncf %5 : vector<8x128xf32> to vector<8x128xbf16>
    %c0_4 = arith.constant 0 : index
    %c0_5 = arith.constant 0 : index
    %7 = vector.load %arg3[%c0_4, %c0_5] : memref<128x128xbf16, #tpu.memory_space<vmem>>, vector<128x128xbf16>
    %cst_6 = arith.constant dense<0.000000e+00> : vector<8x128xf32>
    %8 = tpu.matmul %6, %7, %cst_6 {dimension_numbers = #tpu.dot_dimension_numbers<[1], [1], [0], [0], [0, 0, 1, 0], [], []>} : vector<8x128xbf16>, vector<128x128xbf16>, vector<8x128xf32> -> vector<8x128xf32>
    %cst_7 = arith.constant 0.000000e+00 : f32
    %9 = vector.broadcast %cst_7 : f32 to vector<8x128xf32>
    %10 = arith.maximumf %8, %9 : vector<8x128xf32>
    %11 = arith.truncf %10 : vector<8x128xf32> to vector<8x128xbf16>
    %c0_8 = arith.constant 0 : index
    %c0_9 = arith.constant 0 : index
    %12 = vector.load %arg4[%c0_8, %c0_9] : memref<4x128xbf16, #tpu.memory_space<vmem>>, vector<4x128xbf16>
    %cst_10 = arith.constant dense<0.000000e+00> : vector<8x4xf32>
    %13 = tpu.matmul %11, %12, %cst_10 {dimension_numbers = #tpu.dot_dimension_numbers<[1], [1], [0], [0], [0, 0, 1, 0], [], []>} : vector<8x128xbf16>, vector<4x128xbf16>, vector<8x4xf32> -> vector<8x4xf32>
    %c0_11 = arith.constant 0 : index
    %c0_12 = arith.constant 0 : index
    %14 = vector.load %arg5[%c0_11, %c0_12] : memref<8x4xf32, #tpu.memory_space<vmem>>, vector<8x4xf32>
    tpu.vector_store %arg5[%c0_11, %c0_12], %13 {strides = array<i32>} : memref<8x4xf32, #tpu.memory_space<vmem>>, vector<8x4xf32>,
    return
  }
  func.func @transform_0(%arg0: i32) -> (i32, i32) {
    %c0_i32 = arith.constant 0 : i32
    %c0_i32_0 = arith.constant 0 : i32
    return %arg0, %c0_i32 : i32, i32
  }
  func.func @transform_1(%arg0: i32) -> (i32, i32) {
    %c0_i32 = arith.constant 0 : i32
    %c0_i32_0 = arith.constant 0 : i32
    %c0_i32_1 = arith.constant 0 : i32
    return %c0_i32, %c0_i32_0 : i32, i32
  }
  func.func @transform_2(%arg0: i32) -> (i32, i32) {
    %c0_i32 = arith.constant 0 : i32
    %c0_i32_0 = arith.constant 0 : i32
    %c0_i32_1 = arith.constant 0 : i32
    return %c0_i32, %c0_i32_0 : i32, i32
  }
  func.func @transform_3(%arg0: i32) -> (i32, i32) {
    %c0_i32 = arith.constant 0 : i32
    %c0_i32_0 = arith.constant 0 : i32
    %c0_i32_1 = arith.constant 0 : i32
    return %c0_i32, %c0_i32_0 : i32, i32
  }
  func.func @transform_4(%arg0: i32) -> (i32, i32) {
    %c0_i32 = arith.constant 0 : i32
    %c0_i32_0 = arith.constant 0 : i32
    return %arg0, %c0_i32 : i32, i32
  }
}

</mosaic_0001>

<bundles_post_ra>
// kernel: tpu_custom_call.1
= control target key start
LH: loop header
LB: loop body
LE: loop exit
PB: predicated region body
PF: predicated region fallthrough
CT: control target
= control target key end

     0   :  { %vm76_vm0 = vcmask 130048   ;;  %vm212_vm1 = vcmask 31744   ;;  %s390_s1 = inlined_call_operand.vmem [shape: bf16[128,16], index: 1, kind: input, shape index: {}]   ;;  %s391_s2 = inlined_call_operand.vmem [shape: bf16[128,128], index: 2, kind: input, shape index: {}]   ;;  %s392_s0 = inlined_call_operand.vmem [shape: f32[8,16], index: 0, kind: input, shape index: {}]   ;;  %s393_s3 = inlined_call_operand.vmem [shape: bf16[4,128], index: 3, kind: input, shape index: {}]   ;;  %s394_s4 = inlined_call_operand.vmem [shape: f32[8,4], index: 4, kind: output, shape index: {}]  }
   0x1   :  { %v290_v0 = vld [vmem:[%s390_s1 + $0x38] sm:$0xff]  ;;  %v289_v2 = vld [vmem:[%s390_s1 + $0x30] sm:$0xff]  ;;  %v288_v4 = vld [vmem:[%s390_s1 + $0x28] sm:$0xff] }
   0x2   :  { %v102_v1 = vsel %vm76_vm0, %v290_v0, 0  ;;  %v99_v3 = vsel %vm76_vm0, %v289_v2, 0  ;;  %v96_v5 = vsel %vm76_vm0, %v288_v4, 0  ;;  %v287_v6 = vld [vmem:[%s390_s1 + $0x20] sm:$0xff]  ;;  %v286_v8 = vld [vmem:[%s390_s1 + $0x18] sm:$0xff]  ;;  %v285_v11 = vld [vmem:[%s390_s1 + $0x10] sm:$0xff] }
   0x3   :  { %104 = vmatpush.bf16.xpose.msra.mxu0 %v102_v1  ;;  %v93_v7 = vsel %vm76_vm0, %v287_v6, 0  ;;  %v90_v9 = vsel %vm76_vm0, %v286_v8, 0  ;;  %v298_v10 = vld [vmem:[%s391_s2 + $0x38] sm:$0xff]  ;;  %v87_v12 = vsel %vm76_vm0, %v285_v11, 0  ;;  %v297_v13 = vld [vmem:[%s391_s2 + $0x30] sm:$0xff]  ;;  %v284_v14 = vld [vmem:[%s390_s1 + $0x8] sm:$0xff] }
   0x4   :  { %183 = vmatpush.bf16.xpose.msra.mxu1 %v298_v10  ;;  %v84_v15 = vsel %vm76_vm0, %v284_v14, 0  ;;  %v296_v16 = vld [vmem:[%s391_s2 + $0x28] sm:$0xff]  ;;  %v283_v17 = vld [vmem:[%s390_s1] sm:$0xff]  ;;  %v294_v22 = vld [vmem:[%s391_s2 + $0x18] sm:$0xff] }
   0x5   :  { %v81_v18 = vsel %vm76_vm0, %v283_v17, 0  ;;  %v295_v19 = vld [vmem:[%s391_s2 + $0x20] sm:$0xff]  ;;  %v293_v23 = vld [vmem:[%s391_s2 + $0x10] sm:$0xff]  ;;  %v292_v24 = vld [vmem:[%s391_s2 + $0x8] sm:$0xff] }
   0x6   :  { %v18_v20 = vld [vmem:[%s392_s0] sm:$0xff] }
   0x7   :  { %v19_v21 = vpack.c.bf16 %v18_v20, %v18_v20  ;;  %v291_v25 = vld [vmem:[%s391_s2] sm:$0xff] }
   0x8   :  { %v198_v26 = vld [vmem:[%s393_s3] sm:$0x3] }
   0x9   :  { %206 = vmatpush.bf16.xpose.msra.mxu2 %v198_v26 }
   0xb   :  { %105 = vmatpush.bf16.xpose.msra.mxu0 %v99_v3 }
   0xc   :  { %184 = vmatpush.bf16.xpose.msra.mxu1 %v297_v13 }
  0x13   :  { %106 = vmatpush.bf16.xpose.msra.mxu0 %v96_v5 }
  0x14   :  { %185 = vmatpush.bf16.xpose.msra.mxu1 %v296_v16 }
  0x1b   :  { %107 = vmatpush.bf16.xpose.msra.mxu0 %v93_v7 }
  0x1c   :  { %186 = vmatpush.bf16.xpose.msra.mxu1 %v295_v19 }
  0x23   :  { %108 = vmatpush.bf16.xpose.msra.mxu0 %v90_v9 }
  0x24   :  { %187 = vmatpush.bf16.xpose.msra.mxu1 %v294_v22 }
  0x2b   :  { %109 = vmatpush.bf16.xpose.msra.mxu0 %v87_v12 }
  0x2c   :  { %188 = vmatpush.bf16.xpose.msra.mxu1 %v293_v23 }
  0x33   :  { %110 = vmatpush.bf16.xpose.msra.mxu0 %v84_v15 }
  0x34   :  { %189 = vmatpush.bf16.xpose.msra.mxu1 %v292_v24 }
  0x3b   :  { %111 = vmatpush.bf16.xpose.msra.mxu0 %v81_v18 }
  0x3c   :  { %190 = vmatpush.bf16.xpose.msra.mxu1 %v291_v25 }
  0x42   :  { %250 = vmatmul.msk.bf16.vlgmr.msra.gmra.mxu0 %vm76_vm0, %v19_v21 }
  0xbf   :  { %v113_v27 = vpop.f32.mrf.mxu0 }
  0xc0   :  { %v117_v28 = vmax.f32 %v113_v27, 0.0 }
  0xc2   :  { %v118_v29 = vpack.c.bf16 %v117_v28, %v117_v28 }
  0xc4   :  { %191 = vmatmul.bf16.vlgmr.msra.gmra.mxu1 %v118_v29 }
  0xc7   :  { %v115_v30 = vpop.f32.mrf.mxu0 }
 0x141   :  { %v192_v31 = vpop.f32.mrf.mxu1 }
 0x142   :  { %v196_v32 = vmax.f32 %v192_v31, 0.0 }
 0x144   :  { %v197_v33 = vpack.c.bf16 %v196_v32, %v196_v32 }
 0x146   :  { %207 = vmatmul.bf16.vlgmr.msra.gmra.mxu2 %v197_v33 }
 0x149   :  { %v194_v34 = vpop.f32.mrf.mxu1 }
 0x1c9   :  { %v208_v35 = vpop.f32.mrf.mxu2 }
 0x1ca   :  { %213 = vst.msk [vmem:[%s394_s4] sm:$0xff] %vm212_vm1, %v208_v35 }
 0x1d1   :  { %v210_v36 = vpop.f32.mrf.mxu2 }

</bundles_post_ra>
